<compile_context>
chip_gen: v7x
topology: tpu7x:2x2x1
jax: 0.10.0
libtpu: 0.0.40
codegen_flags: <defaults>
</compile_context>

<pallas_src>
import functools

import jax
import jax.numpy as jnp
import numpy as np
from jax.experimental import pallas as pl
from jax.experimental.pallas import tpu as pltpu


def _bilstm_kernel(x_ref, wih_ref, b_ref, whh_f_ref, wfc_ref, bfc_ref,
                   out_ref, *, hidden_size, block_b, seq_len):
    H = hidden_size
    Bb = block_b
    T = seq_len

    # (1) Hoisted input projection for BOTH directions in one MXU matmul,
    #     biases (b_ih + b_hh, fwd & bwd) folded in. Off the serial path.
    #     x_ref is already the (T*Bb, I) time-major slab for this batch block.
    gates_x = jnp.dot(x_ref[...], wih_ref[...],
                      preferred_element_type=jnp.float32) + b_ref[...]
    # gates_x: (T*Bb, 8H) f32; cols [0:4H] = forward gates, [4H:8H] = reverse.

    whh_f = whh_f_ref[...]                                     # bf16 (H, 4H)

    def gate_split(pre):
        i_g = jax.nn.sigmoid(pre[:, 0 * H:1 * H])
        f_g = jax.nn.sigmoid(pre[:, 1 * H:2 * H])
        g_g = jnp.tanh(pre[:, 2 * H:3 * H])
        o_g = jax.nn.sigmoid(pre[:, 3 * H:4 * H])
        return i_g, f_g, g_g, o_g

    # (2) Forward recurrence, fully unrolled (T static & small). Per-step work
    #     is one (Bb,H)x(H,4H) MXU push + gate math; all slices are static.
    h = jnp.zeros((Bb, H), jnp.float32)
    c = jnp.zeros((Bb, H), jnp.float32)
    for t in range(T):
        pre = (gates_x[t * Bb:(t + 1) * Bb, 0:4 * H]
               + jnp.dot(h.astype(whh_f.dtype), whh_f,
                         preferred_element_type=jnp.float32))
        i_g, f_g, g_g, o_g = gate_split(pre)
        c = f_g * c + i_g * g_g
        h = o_g * jnp.tanh(c)
    h_fwd = h

    # (3) Reverse-direction contribution to out[:, -1, H:]: the reverse LSTM's
    #     FIRST step (sees only x[:, -1]) from the zero state, so the
    #     h @ W_hh_reverse term and f_g * c0 vanish.
    pre_b = gates_x[(T - 1) * Bb:T * Bb, 4 * H:8 * H]
    i_b, _f_b, g_b, o_b = gate_split(pre_b)
    h_bwd = o_b * jnp.tanh(i_b * g_b)

    # (4) Classifier into a lane-dense, zero-padded 128-wide output. Split the
    #     (2H, C_pad) weight rows to avoid a lane concat of h_fwd / h_bwd.
    wfc = wfc_ref[...]                                         # bf16 (2H, C_pad)
    logits = (jnp.dot(h_fwd.astype(wfc.dtype), wfc[:H, :],
                      preferred_element_type=jnp.float32)
              + jnp.dot(h_bwd.astype(wfc.dtype), wfc[H:, :],
                        preferred_element_type=jnp.float32)
              + bfc_ref[...])
    out_ref[...] = logits                                      # unmasked (Bb, 128) store


def bilstm_classifier_forward(x, params, hidden_size, num_classes):
    """x: (B, T, input_size), batch_first like the PyTorch module."""
    B, T, I = x.shape
    H = hidden_size
    compute_dtype = jnp.bfloat16
    c_pad = max(128, ((num_classes + 127) // 128) * 128)

    # Batch-parallel grid (megacore sharding on v7x); weights replicated.
    block_b = 8 if B % 8 == 0 else B
    num_blocks = B // block_b

    # Layout plumbing in the wrapper (no compute hoisted): each batch block's
    # activations become a contiguous time-major (T*block_b, I) slab, so the
    # kernel never reshapes.
    xb = x.reshape(num_blocks, block_b, T, I)
    xb = jnp.transpose(xb, (0, 2, 1, 3))                               # (nb, T, bb, I)
    x2 = xb.reshape(num_blocks * T * block_b, I).astype(compute_dtype)  # (nb*T*bb, I)

    # Both directions' input projections concatenated -> one (I, 8H) weight;
    # all four LSTM bias vectors folded into one (1, 8H) row (kept in f32).
    wih_cat = jnp.concatenate(
        [params["wih_f"], params["wih_b"]], axis=1).astype(compute_dtype)
    b_cat = jnp.concatenate(
        [params["b_f"], params["b_b"]], axis=1).astype(jnp.float32)
    whh_f = params["whh_f"].astype(compute_dtype)

    # Zero-pad the classifier to a lane-dense 128-wide output.
    wfc_pad = jnp.zeros((2 * H, c_pad), compute_dtype
                        ).at[:, :num_classes].set(params["wfc"].astype(compute_dtype))
    bfc_pad = jnp.zeros((1, c_pad), jnp.float32
                        ).at[:, :num_classes].set(params["bfc"].astype(jnp.float32))

    def _full(a):
        return pl.BlockSpec(a.shape, lambda b: (0,) * a.ndim)

    out_pad = pl.pallas_call(
        functools.partial(_bilstm_kernel, hidden_size=H,
                          block_b=block_b, seq_len=T),
        out_shape=jax.ShapeDtypeStruct((B, c_pad), jnp.float32),
        grid=(num_blocks,),
        in_specs=[
            pl.BlockSpec((T * block_b, I), lambda b: (b, 0)),
            _full(wih_cat), _full(b_cat), _full(whh_f),
            _full(wfc_pad), _full(bfc_pad),
        ],
        out_specs=pl.BlockSpec((block_b, c_pad), lambda b: (b, 0)),
        compiler_params=pltpu.CompilerParams(
            dimension_semantics=("parallel",)),
    )(x2, wih_cat, b_cat, whh_f, wfc_pad, bfc_pad)

    return out_pad[:, :num_classes]


def _ref_forward(x, params, hidden_size):
    """Pure-JAX reference mirroring the kernel's bf16-matmul / f32-math recipe."""
    B, T, I = x.shape
    H = hidden_size
    cd = jnp.bfloat16
    xb = x.astype(cd)

    def cell(x_t, h, c, wih, whh, b):
        gates = (jnp.dot(x_t, wih.astype(cd), preferred_element_type=jnp.float32)
                 + jnp.dot(h.astype(cd), whh.astype(cd),
                           preferred_element_type=jnp.float32)
                 + b.astype(jnp.float32))
        i_g = jax.nn.sigmoid(gates[:, 0 * H:1 * H])
        f_g = jax.nn.sigmoid(gates[:, 1 * H:2 * H])
        g_g = jnp.tanh(gates[:, 2 * H:3 * H])
        o_g = jax.nn.sigmoid(gates[:, 3 * H:4 * H])
        c = f_g * c + i_g * g_g
        h = o_g * jnp.tanh(c)
        return h, c

    h = jnp.zeros((B, H), jnp.float32)
    c = jnp.zeros((B, H), jnp.float32)
    for t in range(T):
        h, c = cell(xb[:, t, :], h, c, params["wih_f"], params["whh_f"], params["b_f"])
    h_fwd = h

    h_bwd, _ = cell(xb[:, T - 1, :],
                    jnp.zeros((B, H), jnp.float32), jnp.zeros((B, H), jnp.float32),
                    params["wih_b"], params["whh_b"], params["b_b"])

    feat = jnp.concatenate([h_fwd, h_bwd], axis=-1).astype(cd)
    return (jnp.dot(feat, params["wfc"].astype(cd),
                    preferred_element_type=jnp.float32)
            + params["bfc"].astype(jnp.float32))


def init_params(key, input_size, hidden_size, num_classes):
    """Deterministic init matching PyTorch LSTM/Linear parameter shapes."""
    H = hidden_size
    k_lstm = 1.0 / np.sqrt(H)
    k_fc = 1.0 / np.sqrt(2 * H)
    keys = jax.random.split(key, 10)
    u = lambda k, shape, bound: jax.random.uniform(
        k, shape, jnp.float32, minval=-bound, maxval=bound)

    # PyTorch stores weight_ih as (4H, input); we pre-transpose to (input, 4H).
    wih_f = u(keys[0], (input_size, 4 * H), k_lstm)
    whh_f = u(keys[1], (H, 4 * H), k_lstm)
    b_f = u(keys[2], (1, 4 * H), k_lstm) + u(keys[3], (1, 4 * H), k_lstm)  # b_ih + b_hh
    wih_b = u(keys[4], (input_size, 4 * H), k_lstm)
    whh_b = u(keys[5], (H, 4 * H), k_lstm)
    b_b = u(keys[6], (1, 4 * H), k_lstm) + u(keys[7], (1, 4 * H), k_lstm)
    wfc = u(keys[8], (2 * H, num_classes), k_fc)   # Linear weight, pre-transposed
    bfc = u(keys[9], (1, num_classes), k_fc)
    return dict(wih_f=wih_f, whh_f=whh_f, b_f=b_f,
                wih_b=wih_b, whh_b=whh_b, b_b=b_b,
                wfc=wfc, bfc=bfc)


if __name__ == "__main__":
    B, T, INPUT_SIZE, HIDDEN, NUM_CLASSES = 8, 8, 16, 32, 4

    key = jax.random.PRNGKey(0)
    kx, kp = jax.random.split(key)
    x = jax.random.normal(kx, (B, T, INPUT_SIZE), dtype=jnp.float32)
    params = init_params(kp, INPUT_SIZE, HIDDEN, NUM_CLASSES)

    out = jax.block_until_ready(
        bilstm_classifier_forward(x, params, HIDDEN, NUM_CLASSES))
    ref = jax.block_until_ready(_ref_forward(x, params, HIDDEN))

    np.testing.assert_allclose(np.asarray(out), np.asarray(ref),
                               rtol=5e-3, atol=5e-3)
    assert out.shape == (B, NUM_CLASSES)
    print("KERNEL_OK")
</pallas_src>

<mosaic_0001>
module attributes {stable_mosaic.version = 11 : i64} {
  func.func @_bilstm_kernel(%arg0: i32, %arg1: memref<64x16xbf16, #tpu.memory_space<vmem>>, %arg2: memref<16x256xbf16, #tpu.memory_space<vmem>>, %arg3: memref<1x256xf32, #tpu.memory_space<vmem>>, %arg4: memref<32x128xbf16, #tpu.memory_space<vmem>>, %arg5: memref<64x128xbf16, #tpu.memory_space<vmem>>, %arg6: memref<1x128xf32, #tpu.memory_space<vmem>>, %arg7: memref<8x128xf32, #tpu.memory_space<vmem>>) attributes {dimension_semantics = [#tpu.dimension_semantics<parallel>], iteration_bounds = array<i64: 1>, scalar_prefetch = 0 : i64, scratch_operands = 0 : i64, tpu.core_type = #tpu.core_type<tc>, window_params = [{transform_indices = @transform_0, window_bounds = array<i64: 64, 16>}, {pipeline_mode = #tpu.pipeline_mode<synchronous>, transform_indices = @transform_1, window_bounds = array<i64: 16, 256>}, {pipeline_mode = #tpu.pipeline_mode<synchronous>, transform_indices = @transform_2, window_bounds = array<i64: 1, 256>}, {pipeline_mode = #tpu.pipeline_mode<synchronous>, transform_indices = @transform_3, window_bounds = array<i64: 32, 128>}, {pipeline_mode = #tpu.pipeline_mode<synchronous>, transform_indices = @transform_4, window_bounds = array<i64: 64, 128>}, {pipeline_mode = #tpu.pipeline_mode<synchronous>, transform_indices = @transform_5, window_bounds = array<i64: 1, 128>}, {transform_indices = @transform_6, window_bounds = array<i64: 8, 128>}]} {
    %c0 = arith.constant 0 : index
    %c0_0 = arith.constant 0 : index
    %0 = vector.load %arg1[%c0, %c0_0] : memref<64x16xbf16, #tpu.memory_space<vmem>>, vector<64x16xbf16>
    %c0_1 = arith.constant 0 : index
    %c0_2 = arith.constant 0 : index
    %1 = vector.load %arg2[%c0_1, %c0_2] : memref<16x256xbf16, #tpu.memory_space<vmem>>, vector<16x256xbf16>
    %cst = arith.constant dense<0.000000e+00> : vector<64x256xf32>
    %2 = tpu.matmul %0, %1, %cst {dimension_numbers = #tpu.dot_dimension_numbers<[1], [0], [0], [1], [0, 0, 1, 1], [], []>} : vector<64x16xbf16>, vector<16x256xbf16>, vector<64x256xf32> -> vector<64x256xf32>
    %c0_3 = arith.constant 0 : index
    %c0_4 = arith.constant 0 : index
    %3 = vector.load %arg3[%c0_3, %c0_4] : memref<1x256xf32, #tpu.memory_space<vmem>>, vector<1x256xf32>
    %4 = vector.broadcast %3 : vector<1x256xf32> to vector<64x256xf32>
    %5 = arith.addf %2, %4 : vector<64x256xf32>
    %c0_5 = arith.constant 0 : index
    %c0_6 = arith.constant 0 : index
    %6 = vector.load %arg4[%c0_5, %c0_6] : memref<32x128xbf16, #tpu.memory_space<vmem>>, vector<32x128xbf16>
    %cst_7 = arith.constant 0.000000e+00 : f32
    %7 = vector.broadcast %cst_7 : f32 to vector<8x32xf32>
    %cst_8 = arith.constant 0.000000e+00 : f32
    %8 = vector.broadcast %cst_8 : f32 to vector<8x32xf32>
    %9 = vector.extract_strided_slice %5 {offsets = [0, 0], sizes = [8, 128], strides = [1, 1]} : vector<64x256xf32> to vector<8x128xf32>
    %10 = arith.truncf %7 : vector<8x32xf32> to vector<8x32xbf16>
    %cst_9 = arith.constant dense<0.000000e+00> : vector<8x128xf32>
    %11 = tpu.matmul %10, %6, %cst_9 {dimension_numbers = #tpu.dot_dimension_numbers<[1], [0], [0], [1], [0, 0, 1, 1], [], []>} : vector<8x32xbf16>, vector<32x128xbf16>, vector<8x128xf32> -> vector<8x128xf32>
    %12 = arith.addf %9, %11 : vector<8x128xf32>
    %13 = vector.extract_strided_slice %12 {offsets = [0, 0], sizes = [8, 32], strides = [1, 1]} : vector<8x128xf32> to vector<8x32xf32>
    %14 = arith.negf %13 : vector<8x32xf32>
    %15 = math.exp %14 : vector<8x32xf32>
    %cst_10 = arith.constant 1.000000e+00 : f32
    %16 = vector.broadcast %cst_10 : f32 to vector<8x32xf32>
    %17 = arith.addf %16, %15 : vector<8x32xf32>
    %18 = arith.divf %16, %17 : vector<8x32xf32>
    %19 = vector.extract_strided_slice %12 {offsets = [0, 32], sizes = [8, 32], strides = [1, 1]} : vector<8x128xf32> to vector<8x32xf32>
    %20 = arith.negf %19 : vector<8x32xf32>
    %21 = math.exp %20 : vector<8x32xf32>
    %cst_11 = arith.constant 1.000000e+00 : f32
    %22 = vector.broadcast %cst_11 : f32 to vector<8x32xf32>
    %23 = arith.addf %22, %21 : vector<8x32xf32>
    %24 = arith.divf %22, %23 : vector<8x32xf32>
    %25 = vector.extract_strided_slice %12 {offsets = [0, 64], sizes = [8, 32], strides = [1, 1]} : vector<8x128xf32> to vector<8x32xf32>
    %26 = math.tanh %25 : vector<8x32xf32>
    %27 = vector.extract_strided_slice %12 {offsets = [0, 96], sizes = [8, 32], strides = [1, 1]} : vector<8x128xf32> to vector<8x32xf32>
    %28 = arith.negf %27 : vector<8x32xf32>
    %29 = math.exp %28 : vector<8x32xf32>
    %cst_12 = arith.constant 1.000000e+00 : f32
    %30 = vector.broadcast %cst_12 : f32 to vector<8x32xf32>
    %31 = arith.addf %30, %29 : vector<8x32xf32>
    %32 = arith.divf %30, %31 : vector<8x32xf32>
    %33 = arith.mulf %24, %8 : vector<8x32xf32>
    %34 = arith.mulf %18, %26 : vector<8x32xf32>
    %35 = arith.addf %33, %34 : vector<8x32xf32>
    %36 = math.tanh %35 : vector<8x32xf32>
    %37 = arith.mulf %32, %36 : vector<8x32xf32>
    %38 = vector.extract_strided_slice %5 {offsets = [8, 0], sizes = [8, 128], strides = [1, 1]} : vector<64x256xf32> to vector<8x128xf32>
    %39 = arith.truncf %37 : vector<8x32xf32> to vector<8x32xbf16>
    %cst_13 = arith.constant dense<0.000000e+00> : vector<8x128xf32>
    %40 = tpu.matmul %39, %6, %cst_13 {dimension_numbers = #tpu.dot_dimension_numbers<[1], [0], [0], [1], [0, 0, 1, 1], [], []>} : vector<8x32xbf16>, vector<32x128xbf16>, vector<8x128xf32> -> vector<8x128xf32>
    %41 = arith.addf %38, %40 : vector<8x128xf32>
    %42 = vector.extract_strided_slice %41 {offsets = [0, 0], sizes = [8, 32], strides = [1, 1]} : vector<8x128xf32> to vector<8x32xf32>
    %43 = arith.negf %42 : vector<8x32xf32>
    %44 = math.exp %43 : vector<8x32xf32>
    %cst_14 = arith.constant 1.000000e+00 : f32
    %45 = vector.broadcast %cst_14 : f32 to vector<8x32xf32>
    %46 = arith.addf %45, %44 : vector<8x32xf32>
    %47 = arith.divf %45, %46 : vector<8x32xf32>
    %48 = vector.extract_strided_slice %41 {offsets = [0, 32], sizes = [8, 32], strides = [1, 1]} : vector<8x128xf32> to vector<8x32xf32>
    %49 = arith.negf %48 : vector<8x32xf32>
    %50 = math.exp %49 : vector<8x32xf32>
    %cst_15 = arith.constant 1.000000e+00 : f32
    %51 = vector.broadcast %cst_15 : f32 to vector<8x32xf32>
    %52 = arith.addf %51, %50 : vector<8x32xf32>
    %53 = arith.divf %51, %52 : vector<8x32xf32>
    %54 = vector.extract_strided_slice %41 {offsets = [0, 64], sizes = [8, 32], strides = [1, 1]} : vector<8x128xf32> to vector<8x32xf32>
    %55 = math.tanh %54 : vector<8x32xf32>
    %56 = vector.extract_strided_slice %41 {offsets = [0, 96], sizes = [8, 32], strides = [1, 1]} : vector<8x128xf32> to vector<8x32xf32>
    %57 = arith.negf %56 : vector<8x32xf32>
    %58 = math.exp %57 : vector<8x32xf32>
    %cst_16 = arith.constant 1.000000e+00 : f32
    %59 = vector.broadcast %cst_16 : f32 to vector<8x32xf32>
    %60 = arith.addf %59, %58 : vector<8x32xf32>
    %61 = arith.divf %59, %60 : vector<8x32xf32>
    %62 = arith.mulf %53, %35 : vector<8x32xf32>
    %63 = arith.mulf %47, %55 : vector<8x32xf32>
    %64 = arith.addf %62, %63 : vector<8x32xf32>
    %65 = math.tanh %64 : vector<8x32xf32>
    %66 = arith.mulf %61, %65 : vector<8x32xf32>
    %67 = vector.extract_strided_slice %5 {offsets = [16, 0], sizes = [8, 128], strides = [1, 1]} : vector<64x256xf32> to vector<8x128xf32>
    %68 = arith.truncf %66 : vector<8x32xf32> to vector<8x32xbf16>
    %cst_17 = arith.constant dense<0.000000e+00> : vector<8x128xf32>
    %69 = tpu.matmul %68, %6, %cst_17 {dimension_numbers = #tpu.dot_dimension_numbers<[1], [0], [0], [1], [0, 0, 1, 1], [], []>} : vector<8x32xbf16>, vector<32x128xbf16>, vector<8x128xf32> -> vector<8x128xf32>
    %70 = arith.addf %67, %69 : vector<8x128xf32>
    %71 = vector.extract_strided_slice %70 {offsets = [0, 0], sizes = [8, 32], strides = [1, 1]} : vector<8x128xf32> to vector<8x32xf32>
    %72 = arith.negf %71 : vector<8x32xf32>
    %73 = math.exp %72 : vector<8x32xf32>
    %cst_18 = arith.constant 1.000000e+00 : f32
    %74 = vector.broadcast %cst_18 : f32 to vector<8x32xf32>
    %75 = arith.addf %74, %73 : vector<8x32xf32>
    %76 = arith.divf %74, %75 : vector<8x32xf32>
    %77 = vector.extract_strided_slice %70 {offsets = [0, 32], sizes = [8, 32], strides = [1, 1]} : vector<8x128xf32> to vector<8x32xf32>
    %78 = arith.negf %77 : vector<8x32xf32>
    %79 = math.exp %78 : vector<8x32xf32>
    %cst_19 = arith.constant 1.000000e+00 : f32
    %80 = vector.broadcast %cst_19 : f32 to vector<8x32xf32>
    %81 = arith.addf %80, %79 : vector<8x32xf32>
    %82 = arith.divf %80, %81 : vector<8x32xf32>
    %83 = vector.extract_strided_slice %70 {offsets = [0, 64], sizes = [8, 32], strides = [1, 1]} : vector<8x128xf32> to vector<8x32xf32>
    %84 = math.tanh %83 : vector<8x32xf32>
    %85 = vector.extract_strided_slice %70 {offsets = [0, 96], sizes = [8, 32], strides = [1, 1]} : vector<8x128xf32> to vector<8x32xf32>
    %86 = arith.negf %85 : vector<8x32xf32>
    %87 = math.exp %86 : vector<8x32xf32>
    %cst_20 = arith.constant 1.000000e+00 : f32
    %88 = vector.broadcast %cst_20 : f32 to vector<8x32xf32>
    %89 = arith.addf %88, %87 : vector<8x32xf32>
    %90 = arith.divf %88, %89 : vector<8x32xf32>
    %91 = arith.mulf %82, %64 : vector<8x32xf32>
    %92 = arith.mulf %76, %84 : vector<8x32xf32>
    %93 = arith.addf %91, %92 : vector<8x32xf32>
    %94 = math.tanh %93 : vector<8x32xf32>
    %95 = arith.mulf %90, %94 : vector<8x32xf32>
    %96 = vector.extract_strided_slice %5 {offsets = [24, 0], sizes = [8, 128], strides = [1, 1]} : vector<64x256xf32> to vector<8x128xf32>
    %97 = arith.truncf %95 : vector<8x32xf32> to vector<8x32xbf16>
    %cst_21 = arith.constant dense<0.000000e+00> : vector<8x128xf32>
    %98 = tpu.matmul %97, %6, %cst_21 {dimension_numbers = #tpu.dot_dimension_numbers<[1], [0], [0], [1], [0, 0, 1, 1], [], []>} : vector<8x32xbf16>, vector<32x128xbf16>, vector<8x128xf32> -> vector<8x128xf32>
    %99 = arith.addf %96, %98 : vector<8x128xf32>
    %100 = vector.extract_strided_slice %99 {offsets = [0, 0], sizes = [8, 32], strides = [1, 1]} : vector<8x128xf32> to vector<8x32xf32>
    %101 = arith.negf %100 : vector<8x32xf32>
    %102 = math.exp %101 : vector<8x32xf32>
    %cst_22 = arith.constant 1.000000e+00 : f32
    %103 = vector.broadcast %cst_22 : f32 to vector<8x32xf32>
    %104 = arith.addf %103, %102 : vector<8x32xf32>
    %105 = arith.divf %103, %104 : vector<8x32xf32>
    %106 = vector.extract_strided_slice %99 {offsets = [0, 32], sizes = [8, 32], strides = [1, 1]} : vector<8x128xf32> to vector<8x32xf32>
    %107 = arith.negf %106 : vector<8x32xf32>
    %108 = math.exp %107 : vector<8x32xf32>
    %cst_23 = arith.constant 1.000000e+00 : f32
    %109 = vector.broadcast %cst_23 : f32 to vector<8x32xf32>
    %110 = arith.addf %109, %108 : vector<8x32xf32>
    %111 = arith.divf %109, %110 : vector<8x32xf32>
    %112 = vector.extract_strided_slice %99 {offsets = [0, 64], sizes = [8, 32], strides = [1, 1]} : vector<8x128xf32> to vector<8x32xf32>
    %113 = math.tanh %112 : vector<8x32xf32>
    %114 = vector.extract_strided_slice %99 {offsets = [0, 96], sizes = [8, 32], strides = [1, 1]} : vector<8x128xf32> to vector<8x32xf32>
    %115 = arith.negf %114 : vector<8x32xf32>
    %116 = math.exp %115 : vector<8x32xf32>
    %cst_24 = arith.constant 1.000000e+00 : f32
    %117 = vector.broadcast %cst_24 : f32 to vector<8x32xf32>
    %118 = arith.addf %117, %116 : vector<8x32xf32>
    %119 = arith.divf %117, %118 : vector<8x32xf32>
    %120 = arith.mulf %111, %93 : vector<8x32xf32>
    %121 = arith.mulf %105, %113 : vector<8x32xf32>
    %122 = arith.addf %120, %121 : vector<8x32xf32>
    %123 = math.tanh %122 : vector<8x32xf32>
    %124 = arith.mulf %119, %123 : vector<8x32xf32>
    %125 = vector.extract_strided_slice %5 {offsets = [32, 0], sizes = [8, 128], strides = [1, 1]} : vector<64x256xf32> to vector<8x128xf32>
    %126 = arith.truncf %124 : vector<8x32xf32> to vector<8x32xbf16>
    %cst_25 = arith.constant dense<0.000000e+00> : vector<8x128xf32>
    %127 = tpu.matmul %126, %6, %cst_25 {dimension_numbers = #tpu.dot_dimension_numbers<[1], [0], [0], [1], [0, 0, 1, 1], [], []>} : vector<8x32xbf16>, vector<32x128xbf16>, vector<8x128xf32> -> vector<8x128xf32>
    %128 = arith.addf %125, %127 : vector<8x128xf32>
    %129 = vector.extract_strided_slice %128 {offsets = [0, 0], sizes = [8, 32], strides = [1, 1]} : vector<8x128xf32> to vector<8x32xf32>
    %130 = arith.negf %129 : vector<8x32xf32>
    %131 = math.exp %130 : vector<8x32xf32>
    %cst_26 = arith.constant 1.000000e+00 : f32
    %132 = vector.broadcast %cst_26 : f32 to vector<8x32xf32>
    %133 = arith.addf %132, %131 : vector<8x32xf32>
    %134 = arith.divf %132, %133 : vector<8x32xf32>
    %135 = vector.extract_strided_slice %128 {offsets = [0, 32], sizes = [8, 32], strides = [1, 1]} : vector<8x128xf32> to vector<8x32xf32>
    %136 = arith.negf %135 : vector<8x32xf32>
    %137 = math.exp %136 : vector<8x32xf32>
    %cst_27 = arith.constant 1.000000e+00 : f32
    %138 = vector.broadcast %cst_27 : f32 to vector<8x32xf32>
    %139 = arith.addf %138, %137 : vector<8x32xf32>
    %140 = arith.divf %138, %139 : vector<8x32xf32>
    %141 = vector.extract_strided_slice %128 {offsets = [0, 64], sizes = [8, 32], strides = [1, 1]} : vector<8x128xf32> to vector<8x32xf32>
    %142 = math.tanh %141 : vector<8x32xf32>
    %143 = vector.extract_strided_slice %128 {offsets = [0, 96], sizes = [8, 32], strides = [1, 1]} : vector<8x128xf32> to vector<8x32xf32>
    %144 = arith.negf %143 : vector<8x32xf32>
    %145 = math.exp %144 : vector<8x32xf32>
    %cst_28 = arith.constant 1.000000e+00 : f32
    %146 = vector.broadcast %cst_28 : f32 to vector<8x32xf32>
    %147 = arith.addf %146, %145 : vector<8x32xf32>
    %148 = arith.divf %146, %147 : vector<8x32xf32>
    %149 = arith.mulf %140, %122 : vector<8x32xf32>
    %150 = arith.mulf %134, %142 : vector<8x32xf32>
    %151 = arith.addf %149, %150 : vector<8x32xf32>
    %152 = math.tanh %151 : vector<8x32xf32>
    %153 = arith.mulf %148, %152 : vector<8x32xf32>
    %154 = vector.extract_strided_slice %5 {offsets = [40, 0], sizes = [8, 128], strides = [1, 1]} : vector<64x256xf32> to vector<8x128xf32>
    %155 = arith.truncf %153 : vector<8x32xf32> to vector<8x32xbf16>
    %cst_29 = arith.constant dense<0.000000e+00> : vector<8x128xf32>
    %156 = tpu.matmul %155, %6, %cst_29 {dimension_numbers = #tpu.dot_dimension_numbers<[1], [0], [0], [1], [0, 0, 1, 1], [], []>} : vector<8x32xbf16>, vector<32x128xbf16>, vector<8x128xf32> -> vector<8x128xf32>
    %157 = arith.addf %154, %156 : vector<8x128xf32>
    %158 = vector.extract_strided_slice %157 {offsets = [0, 0], sizes = [8, 32], strides = [1, 1]} : vector<8x128xf32> to vector<8x32xf32>
    %159 = arith.negf %158 : vector<8x32xf32>
    %160 = math.exp %159 : vector<8x32xf32>
    %cst_30 = arith.constant 1.000000e+00 : f32
    %161 = vector.broadcast %cst_30 : f32 to vector<8x32xf32>
    %162 = arith.addf %161, %160 : vector<8x32xf32>
    %163 = arith.divf %161, %162 : vector<8x32xf32>
    %164 = vector.extract_strided_slice %157 {offsets = [0, 32], sizes = [8, 32], strides = [1, 1]} : vector<8x128xf32> to vector<8x32xf32>
    %165 = arith.negf %164 : vector<8x32xf32>
    %166 = math.exp %165 : vector<8x32xf32>
    %cst_31 = arith.constant 1.000000e+00 : f32
    %167 = vector.broadcast %cst_31 : f32 to vector<8x32xf32>
    %168 = arith.addf %167, %166 : vector<8x32xf32>
    %169 = arith.divf %167, %168 : vector<8x32xf32>
    %170 = vector.extract_strided_slice %157 {offsets = [0, 64], sizes = [8, 32], strides = [1, 1]} : vector<8x128xf32> to vector<8x32xf32>
    %171 = math.tanh %170 : vector<8x32xf32>
    %172 = vector.extract_strided_slice %157 {offsets = [0, 96], sizes = [8, 32], strides = [1, 1]} : vector<8x128xf32> to vector<8x32xf32>
    %173 = arith.negf %172 : vector<8x32xf32>
    %174 = math.exp %173 : vector<8x32xf32>
    %cst_32 = arith.constant 1.000000e+00 : f32
    %175 = vector.broadcast %cst_32 : f32 to vector<8x32xf32>
    %176 = arith.addf %175, %174 : vector<8x32xf32>
    %177 = arith.divf %175, %176 : vector<8x32xf32>
    %178 = arith.mulf %169, %151 : vector<8x32xf32>
    %179 = arith.mulf %163, %171 : vector<8x32xf32>
    %180 = arith.addf %178, %179 : vector<8x32xf32>
    %181 = math.tanh %180 : vector<8x32xf32>
    %182 = arith.mulf %177, %181 : vector<8x32xf32>
    %183 = vector.extract_strided_slice %5 {offsets = [48, 0], sizes = [8, 128], strides = [1, 1]} : vector<64x256xf32> to vector<8x128xf32>
    %184 = arith.truncf %182 : vector<8x32xf32> to vector<8x32xbf16>
    %cst_33 = arith.constant dense<0.000000e+00> : vector<8x128xf32>
    %185 = tpu.matmul %184, %6, %cst_33 {dimension_numbers = #tpu.dot_dimension_numbers<[1], [0], [0], [1], [0, 0, 1, 1], [], []>} : vector<8x32xbf16>, vector<32x128xbf16>, vector<8x128xf32> -> vector<8x128xf32>
    %186 = arith.addf %183, %185 : vector<8x128xf32>
    %187 = vector.extract_strided_slice %186 {offsets = [0, 0], sizes = [8, 32], strides = [1, 1]} : vector<8x128xf32> to vector<8x32xf32>
    %188 = arith.negf %187 : vector<8x32xf32>
    %189 = math.exp %188 : vector<8x32xf32>
    %cst_34 = arith.constant 1.000000e+00 : f32
    %190 = vector.broadcast %cst_34 : f32 to vector<8x32xf32>
    %191 = arith.addf %190, %189 : vector<8x32xf32>
    %192 = arith.divf %190, %191 : vector<8x32xf32>
    %193 = vector.extract_strided_slice %186 {offsets = [0, 32], sizes = [8, 32], strides = [1, 1]} : vector<8x128xf32> to vector<8x32xf32>
    %194 = arith.negf %193 : vector<8x32xf32>
    %195 = math.exp %194 : vector<8x32xf32>
    %cst_35 = arith.constant 1.000000e+00 : f32
    %196 = vector.broadcast %cst_35 : f32 to vector<8x32xf32>
    %197 = arith.addf %196, %195 : vector<8x32xf32>
    %198 = arith.divf %196, %197 : vector<8x32xf32>
    %199 = vector.extract_strided_slice %186 {offsets = [0, 64], sizes = [8, 32], strides = [1, 1]} : vector<8x128xf32> to vector<8x32xf32>
    %200 = math.tanh %199 : vector<8x32xf32>
    %201 = vector.extract_strided_slice %186 {offsets = [0, 96], sizes = [8, 32], strides = [1, 1]} : vector<8x128xf32> to vector<8x32xf32>
    %202 = arith.negf %201 : vector<8x32xf32>
    %203 = math.exp %202 : vector<8x32xf32>
    %cst_36 = arith.constant 1.000000e+00 : f32
    %204 = vector.broadcast %cst_36 : f32 to vector<8x32xf32>
    %205 = arith.addf %204, %203 : vector<8x32xf32>
    %206 = arith.divf %204, %205 : vector<8x32xf32>
    %207 = arith.mulf %198, %180 : vector<8x32xf32>
    %208 = arith.mulf %192, %200 : vector<8x32xf32>
    %209 = arith.addf %207, %208 : vector<8x32xf32>
    %210 = math.tanh %209 : vector<8x32xf32>
    %211 = arith.mulf %206, %210 : vector<8x32xf32>
    %212 = vector.extract_strided_slice %5 {offsets = [56, 0], sizes = [8, 128], strides = [1, 1]} : vector<64x256xf32> to vector<8x128xf32>
    %213 = arith.truncf %211 : vector<8x32xf32> to vector<8x32xbf16>
    %cst_37 = arith.constant dense<0.000000e+00> : vector<8x128xf32>
    %214 = tpu.matmul %213, %6, %cst_37 {dimension_numbers = #tpu.dot_dimension_numbers<[1], [0], [0], [1], [0, 0, 1, 1], [], []>} : vector<8x32xbf16>, vector<32x128xbf16>, vector<8x128xf32> -> vector<8x128xf32>
    %215 = arith.addf %212, %214 : vector<8x128xf32>
    %216 = vector.extract_strided_slice %215 {offsets = [0, 0], sizes = [8, 32], strides = [1, 1]} : vector<8x128xf32> to vector<8x32xf32>
    %217 = arith.negf %216 : vector<8x32xf32>
    %218 = math.exp %217 : vector<8x32xf32>
    %cst_38 = arith.constant 1.000000e+00 : f32
    %219 = vector.broadcast %cst_38 : f32 to vector<8x32xf32>
    %220 = arith.addf %219, %218 : vector<8x32xf32>
    %221 = arith.divf %219, %220 : vector<8x32xf32>
    %222 = vector.extract_strided_slice %215 {offsets = [0, 32], sizes = [8, 32], strides = [1, 1]} : vector<8x128xf32> to vector<8x32xf32>
    %223 = arith.negf %222 : vector<8x32xf32>
    %224 = math.exp %223 : vector<8x32xf32>
    %cst_39 = arith.constant 1.000000e+00 : f32
    %225 = vector.broadcast %cst_39 : f32 to vector<8x32xf32>
    %226 = arith.addf %225, %224 : vector<8x32xf32>
    %227 = arith.divf %225, %226 : vector<8x32xf32>
    %228 = vector.extract_strided_slice %215 {offsets = [0, 64], sizes = [8, 32], strides = [1, 1]} : vector<8x128xf32> to vector<8x32xf32>
    %229 = math.tanh %228 : vector<8x32xf32>
    %230 = vector.extract_strided_slice %215 {offsets = [0, 96], sizes = [8, 32], strides = [1, 1]} : vector<8x128xf32> to vector<8x32xf32>
    %231 = arith.negf %230 : vector<8x32xf32>
    %232 = math.exp %231 : vector<8x32xf32>
    %cst_40 = arith.constant 1.000000e+00 : f32
    %233 = vector.broadcast %cst_40 : f32 to vector<8x32xf32>
    %234 = arith.addf %233, %232 : vector<8x32xf32>
    %235 = arith.divf %233, %234 : vector<8x32xf32>
    %236 = arith.mulf %227, %209 : vector<8x32xf32>
    %237 = arith.mulf %221, %229 : vector<8x32xf32>
    %238 = arith.addf %236, %237 : vector<8x32xf32>
    %239 = math.tanh %238 : vector<8x32xf32>
    %240 = arith.mulf %235, %239 : vector<8x32xf32>
    %241 = vector.extract_strided_slice %5 {offsets = [56, 128], sizes = [8, 128], strides = [1, 1]} : vector<64x256xf32> to vector<8x128xf32>
    %242 = vector.extract_strided_slice %241 {offsets = [0, 0], sizes = [8, 32], strides = [1, 1]} : vector<8x128xf32> to vector<8x32xf32>
    %243 = arith.negf %242 : vector<8x32xf32>
    %244 = math.exp %243 : vector<8x32xf32>
    %cst_41 = arith.constant 1.000000e+00 : f32
    %245 = vector.broadcast %cst_41 : f32 to vector<8x32xf32>
    %246 = arith.addf %245, %244 : vector<8x32xf32>
    %247 = arith.divf %245, %246 : vector<8x32xf32>
    %248 = vector.extract_strided_slice %241 {offsets = [0, 64], sizes = [8, 32], strides = [1, 1]} : vector<8x128xf32> to vector<8x32xf32>
    %249 = math.tanh %248 : vector<8x32xf32>
    %250 = vector.extract_strided_slice %241 {offsets = [0, 96], sizes = [8, 32], strides = [1, 1]} : vector<8x128xf32> to vector<8x32xf32>
    %251 = arith.negf %250 : vector<8x32xf32>
    %252 = math.exp %251 : vector<8x32xf32>
    %cst_42 = arith.constant 1.000000e+00 : f32
    %253 = vector.broadcast %cst_42 : f32 to vector<8x32xf32>
    %254 = arith.addf %253, %252 : vector<8x32xf32>
    %255 = arith.divf %253, %254 : vector<8x32xf32>
    %256 = arith.mulf %247, %249 : vector<8x32xf32>
    %257 = math.tanh %256 : vector<8x32xf32>
    %258 = arith.mulf %255, %257 : vector<8x32xf32>
    %c0_43 = arith.constant 0 : index
    %c0_44 = arith.constant 0 : index
    %259 = vector.load %arg5[%c0_43, %c0_44] : memref<64x128xbf16, #tpu.memory_space<vmem>>, vector<64x128xbf16>
    %260 = arith.truncf %240 : vector<8x32xf32> to vector<8x32xbf16>
    %261 = vector.extract_strided_slice %259 {offsets = [0, 0], sizes = [32, 128], strides = [1, 1]} : vector<64x128xbf16> to vector<32x128xbf16>
    %cst_45 = arith.constant dense<0.000000e+00> : vector<8x128xf32>
    %262 = tpu.matmul %260, %261, %cst_45 {dimension_numbers = #tpu.dot_dimension_numbers<[1], [0], [0], [1], [0, 0, 1, 1], [], []>} : vector<8x32xbf16>, vector<32x128xbf16>, vector<8x128xf32> -> vector<8x128xf32>
    %263 = arith.truncf %258 : vector<8x32xf32> to vector<8x32xbf16>
    %264 = vector.extract_strided_slice %259 {offsets = [32, 0], sizes = [32, 128], strides = [1, 1]} : vector<64x128xbf16> to vector<32x128xbf16>
    %cst_46 = arith.constant dense<0.000000e+00> : vector<8x128xf32>
    %265 = tpu.matmul %263, %264, %cst_46 {dimension_numbers = #tpu.dot_dimension_numbers<[1], [0], [0], [1], [0, 0, 1, 1], [], []>} : vector<8x32xbf16>, vector<32x128xbf16>, vector<8x128xf32> -> vector<8x128xf32>
    %266 = arith.addf %262, %265 : vector<8x128xf32>
    %c0_47 = arith.constant 0 : index
    %c0_48 = arith.constant 0 : index
    %267 = vector.load %arg6[%c0_47, %c0_48] : memref<1x128xf32, #tpu.memory_space<vmem>>, vector<1x128xf32>
    %268 = vector.broadcast %267 : vector<1x128xf32> to vector<8x128xf32>
    %269 = arith.addf %266, %268 : vector<8x128xf32>
    %c0_49 = arith.constant 0 : index
    %c0_50 = arith.constant 0 : index
    %270 = vector.load %arg7[%c0_49, %c0_50] : memref<8x128xf32, #tpu.memory_space<vmem>>, vector<8x128xf32>
    tpu.vector_store %arg7[%c0_49, %c0_50], %269 {strides = array<i32>} : memref<8x128xf32, #tpu.memory_space<vmem>>, vector<8x128xf32>,
    return
  }
  func.func @transform_0(%arg0: i32) -> (i32, i32) {
    %c0_i32 = arith.constant 0 : i32
    %c0_i32_0 = arith.constant 0 : i32
    return %arg0, %c0_i32 : i32, i32
  }
  func.func @transform_1(%arg0: i32) -> (i32, i32) {
    %c0_i32 = arith.constant 0 : i32
    %c0_i32_0 = arith.constant 0 : i32
    %c0_i32_1 = arith.constant 0 : i32
    return %c0_i32, %c0_i32_0 : i32, i32
  }
  func.func @transform_2(%arg0: i32) -> (i32, i32) {
    %c0_i32 = arith.constant 0 : i32
    %c0_i32_0 = arith.constant 0 : i32
    %c0_i32_1 = arith.constant 0 : i32
    return %c0_i32, %c0_i32_0 : i32, i32
  }
  func.func @transform_3(%arg0: i32) -> (i32, i32) {
    %c0_i32 = arith.constant 0 : i32
    %c0_i32_0 = arith.constant 0 : i32
    %c0_i32_1 = arith.constant 0 : i32
    return %c0_i32, %c0_i32_0 : i32, i32
  }
  func.func @transform_4(%arg0: i32) -> (i32, i32) {
    %c0_i32 = arith.constant 0 : i32
    %c0_i32_0 = arith.constant 0 : i32
    %c0_i32_1 = arith.constant 0 : i32
    return %c0_i32, %c0_i32_0 : i32, i32
  }
  func.func @transform_5(%arg0: i32) -> (i32, i32) {
    %c0_i32 = arith.constant 0 : i32
    %c0_i32_0 = arith.constant 0 : i32
    %c0_i32_1 = arith.constant 0 : i32
    return %c0_i32, %c0_i32_0 : i32, i32
  }
  func.func @transform_6(%arg0: i32) -> (i32, i32) {
    %c0_i32 = arith.constant 0 : i32
    %c0_i32_0 = arith.constant 0 : i32
    return %arg0, %c0_i32 : i32, i32
  }
}

</mosaic_0001>

<bundles_post_ra>
// kernel: tpu_custom_call.1
= control target key start
LH: loop header
LB: loop body
LE: loop exit
PB: predicated region body
PF: predicated region fallthrough
CT: control target
= control target key end

     0   :  { %11 = vsyncpa [#allocation3], 0  ;;  %s1459_s0 = inlined_call_operand.vmem [shape: bf16[64,16], index: 0, kind: input, shape index: {}]   ;;  %s1460_s1 = inlined_call_operand.vmem [shape: bf16[16,256], index: 1, kind: input, shape index: {}]   ;;  %s1461_s2 = inlined_call_operand.vmem [shape: f32[1,256], index: 2, kind: input, shape index: {}]   ;;  %s1462_s3 = inlined_call_operand.hbm [shape: bf16[32,128], index: 3, kind: input, shape index: {}]   ;;  %s1463_s4 = inlined_call_operand.vmem [shape: bf16[64,128], index: 4, kind: input, shape index: {}]   ;;  %s1464_s5 = inlined_call_operand.vmem [shape: f32[1,128], index: 5, kind: input, shape index: {}]   ;;  %s1465_s6 = inlined_call_operand.hbm [shape: f32[8,128], index: 6, kind: output, shape index: {}]  }
   0x1   :  { %12 = vsyncpa [#allocation4], 0  ;;  %s1214_s21 = smov [#allocation2]   ;;  %s1166_s25 = scalar_lea.hbm %s1462_s3, 256 }
   0x2   :  { %s24_s22 = sshll.u32 %s1214_s21, 4  ;;  %p1167_p0 = scmp.ne.s32.totalorder %s1462_s3, %s1166_s25  ;;  %s25_s22 = int_to_ptr.vmem [resolvable:$true] %s24_s22 }
   0x3   :  { %p1170_p1 = scmp.lt.u32.totalorder %s1166_s25, %s1462_s3 }
   0x5   :  { %p1172_p2 = pnand %p1170_p1, %p1167_p0 }
   0x7   :  { %1175 = shalt.err (!%p1172_p2)
}
   0x8   :  { %s1176_s30 = scalar_lea.vmem %s25_s22, 256  ;;  %p1181_p4 = scmp.lt.s32.totalorder %s25_s22, %s25_s22 }
   0x9   :  { %p1177_p3 = scmp.ne.s32.totalorder %s25_s22, %s1176_s30  ;;  %p1182_p5 = scmp.lt.s32.totalorder %s1176_s30, %s1176_s30 }
   0xb   :  { %p1183_p6 = por %p1182_p5, %p1181_p4 }
   0xd   :  { %p1184_p7 = pnand %p1183_p6, %p1177_p3 }
   0xf   :  { %1187 = shalt.err (!%p1184_p7)
}
  0x10   :  { %s1215_s7 = smov 64   ;;  %s1216_s8 = smov 4  }
  0x11   :  { %30 = dma.hbm_to_vmem [thread:$0]  %s1462_s3, 256, %s25_s22, [#allocation3], %s1215_s7, %s1215_s7, %s1216_s8  }
  0x12   :  { %1210 = dma.done.wait [#allocation3], 256  }
  0x13   :  { %1211 = vsyncadd [#allocation3], 4294967040  ;;  %v1217_v0 = vmov 0.0   ;;  %v1218_v1 = vmov 0   ;;  %vm1219_vm0 = vmmov 0   ;;  %v1279_v3 = vld [vmem:[#allocation2] sm:$0xff]   ;;  %v51_v7 = vlaneseq }
  0x14   :  { %992 = vmatprep.subr.bf16.mxu1 %v1217_v0  ;;  %136 = vmatprep.mubr.bf16.mxu0 %v1218_v1  ;;  %v1081_v2 = vld [vmem:[%s1460_s1 + $0x4] ss:$8 sps:$4 sm:$0xff]   ;;  %v1084_v4 = vld [vmem:[%s1460_s1] ss:$8 sps:$4 sm:$0xff]   ;;  %vm91_vm1 = vcmask 130048   ;;  %vm186_vm2 = vcmask 261120  }
  0x15   :  { %996 = vmatprep.mubr.msk.bf16.mxu1 %vm1219_vm0, %v1217_v0  ;;  %104 = vmatprep.subr.bf16.mxu0 %v1081_v2  ;;  %v1085_v5 = vld [vmem:[%s1459_s0] sm:$0xff]   ;;  %v1289_v6 = vld [vmem:[#allocation2 + $0x8] sm:$0xff]   ;;  %v1307_v8 = vshrl.u32 %v51_v7, 7  ;;  %s1221_s24 = smov 96   ;;  %s1222_s8 = smov [#allocation5]  }
  0x16   :  { %993 = vmatpush3.bf16.msra.mxu1 %v1279_v3  ;;  %105 = vmatpush1.bf16.msra.mxu0 %v1084_v4  ;;  %v1313_v10 = vld [vmem:[%s1461_s2] sm:$0x3]  ;;  %s1220_s2 = smov 32   ;;  %v1087_v53 = vld [vmem:[%s1459_s0 + $0x8] sm:$0xff]   ;;  %s918_s9 = sshll.u32 %s1222_s8, 4  ;;  %s919_s9 = int_to_ptr.vmem [resolvable:$true] %s918_s9 }
  0x17   :  { %994 = vmatprep.subr.bf16.mxu1 %v1217_v0  ;;  %1024 = vmatprep.subr.bf16.mxu0 %v1217_v0  ;;  %v53_v9 = vsub.s32 0, %v1307_v8  ;;  %s1188_s10 = scalar_lea.vmem %s919_s9, 128  ;;  %p1193_p9 = scmp.lt.s32.totalorder %s919_s9, %s919_s9 }
  0x18   :  { %p1189_p8 = scmp.ne.s32.totalorder %s919_s9, %s1188_s10  ;;  %p1194_p10 = scmp.lt.s32.totalorder %s1188_s10, %s1188_s10 }
  0x19   :  { %933 = vmatmul.mubr.msk.bf16.vlgmr.msra.gmra.mrb[0].mxu0 %vm91_vm1, %v1085_v5  ;;  %v1316_v11 = vrot.slane %v1313_v10, %v53_v9 }
  0x1a   :  { %995 = vmatpush3.bf16.msra.mxu1 %v1289_v6  ;;  %144 = vmatprep.mubr.bf16.mxu0 %v1218_v1  ;;  %p1195_p11 = por %p1194_p10, %p1193_p9 }
  0x1b   :  { %1000 = vmatprep.subr.bf16.mxu1 %v1217_v0  ;;  %1025 = vmatpush3.bf16.msra.mxu0 %v1279_v3 }
  0x1c   :  { %1026 = vmatprep.subr.bf16.mxu0 %v1217_v0  ;;  %p1196_p12 = pnand %p1195_p11, %p1189_p8 }
  0x1d   :  { %997 = vmatmul.mubr.bf16.vlgmr.msra.gmra.mrb[0].mxu1 %v1218_v1 }
  0x1e   :  { %1001 = vmatpush3.bf16.msra.mxu1 %v1279_v3  ;;  %1004 = vmatprep.mubr.msk.bf16.mxu1 %vm1219_vm0, %v1217_v0 }
  0x1f   :  { %1002 = vmatprep.subr.bf16.mxu1 %v1217_v0  ;;  %1027 = vmatpush3.bf16.msra.mxu0 %v1289_v6 }
  0x20   :  { %1040 = vmatprep.subr.bf16.mxu0 %v1217_v0 }
  0x21   :  { %934 = vmatmul.mubr.msk.bf16.gmra.mrb[4].mxu0 %vm91_vm1, %v1087_v53 }
  0x22   :  { %1003 = vmatpush3.bf16.msra.mxu1 %v1289_v6  ;;  %152 = vmatprep.mubr.bf16.mxu0 %v1218_v1 }
  0x23   :  { %1008 = vmatprep.subr.bf16.mxu1 %v1217_v0 }
  0xec   :  { %v138_v12 = vpop.f32.mrb[0].mxu0 }
  0xed   :  { %v139_v13 = vadd.f32 %v138_v12, %v1316_v11  ;;  %v140_v14 = vpop.f32.mrb[1].mxu0 }
  0xee   :  { %v141_v15 = vpop.f32.mrb[2].mxu0 }
  0xef   :  { %v143_v16 = vpop.f32.mrb[3].mxu0  ;;  %v142_v37 = vadd.f32 %v141_v15, %v1316_v11 }
  0xf0   :  { %v224_v17 = vpop.f32.mrb[0].mxu1 }
  0xf1   :  { %v230_v18 = vadd.f32 %v224_v17, %v139_v13  ;;  %v998_v19 = vpop.f32.mrb[1].mxu1 }
  0xf2   :  { %v227_v20 = vpop.f32.mrb[2].mxu1 }
  0xf3   :  { %v999_v21 = vpop.f32.mrb[3].mxu1  ;;  %1094 = vtanh.f32 %v230_v18  ;;  %v939_v23 = vmul.f32 -1.442695, %v230_v18 }
  0xf4   :  { %v146_v58 = vpop.f32.mrb[4].mxu0 }
  0xf5   :  { %1096 = vpow2.f32 %v939_v23  ;;  %v148_v59 = vpop.f32.mrb[5].mxu0  ;;  %v147_v63 = vadd.f32 %v146_v58, %v1316_v11 }
  0xf6   :  { %v149_v60 = vpop.f32.mrb[6].mxu0 }
  0xf7   :  { %v151_v61 = vpop.f32.mrb[7].mxu0 }
  0xfd   :  { %v1095_v22 = vpop.eup %1094 }
  0xfe   :  { %240 = vrot.lane.b32.xlu0 %v1095_v22, %s1215_s7 }
  0xff   :  { %v1097_v24 = vpop.eup %1096 }
 0x100   :  { %v234_v25 = vadd.f32 1.0, %v1097_v24 }
 0x102   :  { %1098 = vrcp.f32 %v234_v25 }
 0x10c   :  { %v1099_v26 = vpop.eup %1098 }
 0x10d   :  { %v238_v29 = vmul.f32 0.0, %v1099_v26 }
 0x170   :  { %v241_v27 = vpop.permute.xlu0 %240 }
 0x171   :  { %v243_v28 = vmul.f32 %v1099_v26, %v241_v27  ;;  %v150_v27 = vadd.f32 %v149_v60, %v1316_v11 }
 0x173   :  { %245 = vrot.lane.b32.xlu0 %v243_v28, %s1220_s2 }
 0x1e5   :  { %v246_v30 = vpop.permute.xlu0 %245 }
 0x1e6   :  { %v248_v31 = vadd.f32 %v246_v30, %v238_v29 }
 0x1e8   :  { %1100 = vtanh.f32 %v248_v31 }
 0x1f2   :  { %v1101_v32 = vpop.eup %1100 }
 0x1f3   :  { %251 = vrot.lane.b32.xlu1 %v1101_v32, %s1215_s7 }
 0x265   :  { %v252_v33 = vpop.permute.xlu1 %251 }
 0x266   :  { %v254_v34 = vmul.f32 %v1099_v26, %v252_v33 }
 0x268   :  { %v255_v35 = vpack.c.bf16 %v254_v34, %v254_v34 }
 0x26a   :  { %257 = vrot.lane.b32.xlu1 %v255_v35, %s1220_s2 }
 0x2dc   :  { %v258_v36 = vpop.permute.xlu1 %257 }
 0x2dd   :  { %1005 = vmatmul.mubr.msk.bf16.vlgmr.msra.gmra.mrb[4].mxu1 %vm186_vm2, %v258_v36 }
 0x2de   :  { %1009 = vmatpush3.bf16.msra.mxu1 %v1279_v3  ;;  %1012 = vmatprep.mubr.msk.bf16.mxu1 %vm1219_vm0, %v1217_v0 }
 0x2df   :  { %1010 = vmatprep.subr.bf16.mxu1 %v1217_v0 }
 0x2e2   :  { %1011 = vmatpush3.bf16.msra.mxu1 %v1289_v6 }
 0x2e3   :  { %1016 = vmatprep.subr.bf16.mxu1 %v1217_v0 }
 0x3b0   :  { %v296_v38 = vpop.f32.mrb[4].mxu1 }
 0x3b1   :  { %v302_v39 = vadd.f32 %v296_v38, %v142_v37  ;;  %v1006_v40 = vpop.f32.mrb[5].mxu1 }
 0x3b2   :  { %v299_v41 = vpop.f32.mrb[6].mxu1 }
 0x3b3   :  { %1102 = vtanh.f32 %v302_v39  ;;  %v1007_v42 = vpop.f32.mrb[7].mxu1  ;;  %v941_v44 = vmul.f32 -1.442695, %v302_v39 }
 0x3b5   :  { %1104 = vpow2.f32 %v941_v44  ;;  %v1089_v44 = vld [vmem:[%s1459_s0 + $0x18] sm:$0xff]  }
 0x3bd   :  { %v1103_v43 = vpop.eup %1102 }
 0x3be   :  { %312 = vrot.lane.b32.xlu0 %v1103_v43, %s1215_s7  ;;  %v1088_v43 = vld [vmem:[%s1459_s0 + $0x10] sm:$0xff]  }
 0x3bf   :  { %v1105_v45 = vpop.eup %1104  ;;  %935 = vmatmul.mubr.msk.bf16.gmra.mrb[8].mxu0 %vm91_vm1, %v1088_v43 }
 0x3c0   :  { %v306_v46 = vadd.f32 1.0, %v1105_v45  ;;  %160 = vmatprep.mubr.bf16.mxu0 %v1218_v1 }
 0x3c2   :  { %1106 = vrcp.f32 %v306_v46 }
 0x3c7   :  { %936 = vmatmul.mubr.msk.bf16.gmra.mrb[12].mxu0 %vm91_vm1, %v1089_v44 }
 0x3c8   :  { %1028 = vmatprep.mubr.msk.bf16.mxu0 %vm1219_vm0, %v1217_v0 }
 0x3cc   :  { %v1107_v47 = vpop.eup %1106 }
 0x3cd   :  { %v310_v50 = vmul.f32 %v1107_v47, %v248_v31 }
 0x430   :  { %v313_v48 = vpop.permute.xlu0 %312 }
 0x431   :  { %v315_v49 = vmul.f32 %v1107_v47, %v313_v48 }
 0x433   :  { %317 = vrot.lane.b32.xlu1 %v315_v49, %s1220_s2 }
 0x492   :  { %v154_v49 = vpop.f32.mrb[8].mxu0 }
 0x4a5   :  { %v318_v51 = vpop.permute.xlu1 %317 }
 0x4a6   :  { %v320_v52 = vadd.f32 %v318_v51, %v310_v50  ;;  %v156_v50 = vpop.f32.mrb[9].mxu0 }
 0x4a7   :  { %v157_v1 = vpop.f32.mrb[10].mxu0 }
 0x4a8   :  { %1108 = vtanh.f32 %v320_v52  ;;  %v159_v51 = vpop.f32.mrb[11].mxu0 }
 0x4b2   :  { %v1109_v54 = vpop.eup %1108 }
 0x4b3   :  { %323 = vrot.lane.b32.xlu0 %v1109_v54, %s1215_s7 }
 0x525   :  { %v324_v55 = vpop.permute.xlu0 %323 }
 0x526   :  { %v326_v56 = vmul.f32 %v1107_v47, %v324_v55 }
 0x528   :  { %v327_v57 = vpack.c.bf16 %v326_v56, %v326_v56 }
 0x52a   :  { %329 = vrot.lane.b32.xlu1 %v327_v57, %s1220_s2  ;;  %v155_v57 = vadd.f32 %v154_v49, %v1316_v11 }
 0x59c   :  { %v330_v62 = vpop.permute.xlu1 %329 }
 0x59d   :  { %1013 = vmatmul.mubr.msk.bf16.vlgmr.msra.gmra.mrb[8].mxu1 %vm186_vm2, %v330_v62 }
 0x59e   :  { %1017 = vmatpush3.bf16.msra.mxu1 %v1279_v3  ;;  %1020 = vmatprep.mubr.msk.bf16.mxu1 %vm1219_vm0, %v1217_v0 }
 0x59f   :  { %1018 = vmatprep.subr.bf16.mxu1 %v1217_v0 }
 0x5a2   :  { %1019 = vmatpush3.bf16.msra.mxu1 %v1289_v6 }
 0x5a3   :  { %1032 = vmatprep.subr.bf16.mxu1 %v1217_v0 }
 0x670   :  { %v368_v2 = vpop.f32.mrb[8].mxu1 }
 0x671   :  { %v374_v4 = vadd.f32 %v368_v2, %v147_v63  ;;  %v1014_v5 = vpop.f32.mrb[9].mxu1 }
 0x672   :  { %v371_v7 = vpop.f32.mrb[10].mxu1 }
 0x673   :  { %1110 = vtanh.f32 %v374_v4  ;;  %v1015_v9 = vpop.f32.mrb[11].mxu1  ;;  %v943_v13 = vmul.f32 -1.442695, %v374_v4 }
 0x675   :  { %1112 = vpow2.f32 %v943_v13 }
 0x67d   :  { %v1111_v12 = vpop.eup %1110 }
 0x67e   :  { %384 = vrot.lane.b32.xlu0 %v1111_v12, %s1215_s7 }
 0x67f   :  { %v1113_v14 = vpop.eup %1112 }
 0x680   :  { %v378_v15 = vadd.f32 1.0, %v1113_v14 }
 0x682   :  { %1114 = vrcp.f32 %v378_v15 }
 0x68c   :  { %v1115_v16 = vpop.eup %1114 }
 0x68d   :  { %v382_v19 = vmul.f32 %v1115_v16, %v320_v52  ;;  %v1375_v52 = vpop.f32.mrb[12].mxu0 }
 0x68e   :  { %v164_v53 = vpop.f32.mrb[13].mxu0 }
 0x68f   :  { %v1377_v54 = vpop.f32.mrb[14].mxu0 }
 0x690   :  { %v1379_v55 = vpop.f32.mrb[15].mxu0 }
 0x6f0   :  { %v385_v17 = vpop.permute.xlu0 %384 }
 0x6f1   :  { %v387_v18 = vmul.f32 %v1115_v16, %v385_v17 }
 0x6f3   :  { %389 = vrot.lane.b32.xlu1 %v387_v18, %s1220_s2 }
 0x765   :  { %v390_v20 = vpop.permute.xlu1 %389 }
 0x766   :  { %v392_v21 = vadd.f32 %v390_v20, %v382_v19 }
 0x768   :  { %1116 = vtanh.f32 %v392_v21 }
 0x772   :  { %v1117_v22 = vpop.eup %1116 }
 0x773   :  { %395 = vrot.lane.b32.xlu0 %v1117_v22, %s1215_s7 }
 0x7e5   :  { %v396_v23 = vpop.permute.xlu0 %395 }
 0x7e6   :  { %v398_v24 = vmul.f32 %v1115_v16, %v396_v23 }
 0x7e8   :  { %v399_v25 = vpack.c.bf16 %v398_v24, %v398_v24 }
 0x7ea   :  { %401 = vrot.lane.b32.xlu1 %v399_v25, %s1220_s2 }
 0x85c   :  { %v402_v26 = vpop.permute.xlu1 %401 }
 0x85d   :  { %1021 = vmatmul.mubr.msk.bf16.vlgmr.msra.gmra.mrb[12].mxu1 %vm186_vm2, %v402_v26 }
 0x85e   :  { %1033 = vmatpush3.bf16.msra.mxu1 %v1279_v3  ;;  %1036 = vmatprep.mubr.msk.bf16.mxu1 %vm1219_vm0, %v1217_v0 }
 0x85f   :  { %1034 = vmatprep.subr.bf16.mxu1 %v1217_v0 }
 0x862   :  { %1035 = vmatpush3.bf16.msra.mxu1 %v1289_v6 }
 0x863   :  { %1048 = vmatprep.subr.bf16.mxu1 %v1217_v0 }
 0x930   :  { %v440_v28 = vpop.f32.mrb[12].mxu1 }
 0x931   :  { %v446_v29 = vadd.f32 %v440_v28, %v150_v27  ;;  %v1022_v30 = vpop.f32.mrb[13].mxu1 }
 0x932   :  { %v443_v31 = vpop.f32.mrb[14].mxu1 }
 0x933   :  { %1118 = vtanh.f32 %v446_v29  ;;  %v1023_v32 = vpop.f32.mrb[15].mxu1  ;;  %v945_v34 = vmul.f32 -1.442695, %v446_v29 }
 0x935   :  { %1120 = vpow2.f32 %v945_v34 }
 0x93d   :  { %v1119_v33 = vpop.eup %1118 }
 0x93e   :  { %456 = vrot.lane.b32.xlu0 %v1119_v33, %s1215_s7 }
 0x93f   :  { %v1121_v35 = vpop.eup %1120 }
 0x940   :  { %v450_v36 = vadd.f32 1.0, %v1121_v35 }
 0x942   :  { %1122 = vrcp.f32 %v450_v36 }
 0x94c   :  { %v1123_v37 = vpop.eup %1122 }
 0x94d   :  { %v454_v40 = vmul.f32 %v1123_v37, %v392_v21  ;;  %v158_v21 = vadd.f32 %v157_v1, %v1316_v11 }
 0x9b0   :  { %v457_v38 = vpop.permute.xlu0 %456 }
 0x9b1   :  { %v459_v39 = vmul.f32 %v1123_v37, %v457_v38 }
 0x9b3   :  { %461 = vrot.lane.b32.xlu1 %v459_v39, %s1220_s2 }
 0xa25   :  { %v462_v41 = vpop.permute.xlu1 %461 }
 0xa26   :  { %v464_v42 = vadd.f32 %v462_v41, %v454_v40  ;;  %v163_v40 = vadd.f32 %v1375_v52, %v1316_v11 }
 0xa28   :  { %1124 = vtanh.f32 %v464_v42 }
 0xa32   :  { %v1125_v45 = vpop.eup %1124 }
 0xa33   :  { %467 = vrot.lane.b32.xlu0 %v1125_v45, %s1215_s7 }
 0xaa5   :  { %v468_v46 = vpop.permute.xlu0 %467 }
 0xaa6   :  { %v470_v47 = vmul.f32 %v1123_v37, %v468_v46 }
 0xaa8   :  { %v471_v48 = vpack.c.bf16 %v470_v47, %v470_v47 }
 0xaaa   :  { %473 = vrot.lane.b32.xlu1 %v471_v48, %s1220_s2 }
 0xb1c   :  { %v474_v56 = vpop.permute.xlu1 %473 }
 0xb1d   :  { %1029 = vmatmul.mubr.msk.bf16.vlgmr.msra.gmra.mrb[16].mxu0 %vm186_vm2, %v474_v56 }
 0xb1e   :  { %1041 = vmatpush3.bf16.msra.mxu0 %v1279_v3  ;;  %1044 = vmatprep.mubr.msk.bf16.mxu0 %vm1219_vm0, %v1217_v0 }
 0xb1f   :  { %1042 = vmatprep.subr.bf16.mxu0 %v1217_v0 }
 0xb22   :  { %1043 = vmatpush3.bf16.msra.mxu0 %v1289_v6 }
 0xb23   :  { %1056 = vmatprep.subr.bf16.mxu0 %v1217_v0 }
 0xbf0   :  { %v512_v58 = vpop.f32.mrb[16].mxu0 }
 0xbf1   :  { %v518_v59 = vadd.f32 %v512_v58, %v155_v57  ;;  %v1030_v60 = vpop.f32.mrb[17].mxu0 }
 0xbf2   :  { %v515_v61 = vpop.f32.mrb[18].mxu0 }
 0xbf3   :  { %1126 = vtanh.f32 %v518_v59  ;;  %v1031_v62 = vpop.f32.mrb[19].mxu0  ;;  %v947_v2 = vmul.f32 -1.442695, %v518_v59 }
 0xbf4   :  { %v57_v62 = vsub.s32 1, %v1307_v8 }
 0xbf5   :  { %1128 = vpow2.f32 %v947_v2 }
 0xbf6   :  { %v58_v2 = vrot.slane %v1313_v10, %v57_v62 }
 0xbfd   :  { %v1127_v63 = vpop.eup %1126 }
 0xbfe   :  { %528 = vrot.lane.b32.xlu0 %v1127_v63, %s1215_s7  ;;  %v166_v63 = vadd.f32 %v1377_v54, %v1316_v11 }
 0xbff   :  { %v1129_v4 = vpop.eup %1128 }
 0xc00   :  { %v522_v5 = vadd.f32 1.0, %v1129_v4 }
 0xc02   :  { %1130 = vrcp.f32 %v522_v5 }
 0xc0c   :  { %v1131_v7 = vpop.eup %1130 }
 0xc0d   :  { %v526_v13 = vmul.f32 %v1131_v7, %v464_v42 }
 0xc70   :  { %v529_v9 = vpop.permute.xlu0 %528 }
 0xc71   :  { %v531_v12 = vmul.f32 %v1131_v7, %v529_v9 }
 0xc73   :  { %533 = vrot.lane.b32.xlu1 %v531_v12, %s1220_s2  ;;  %v168_v12 = vadd.f32 %v1379_v55, %v58_v2 }
 0xce5   :  { %v534_v14 = vpop.permute.xlu1 %533 }
 0xce6   :  { %v536_v15 = vadd.f32 %v534_v14, %v526_v13 }
 0xce8   :  { %1132 = vtanh.f32 %v536_v15 }
 0xcf2   :  { %v1133_v16 = vpop.eup %1132 }
 0xcf3   :  { %539 = vrot.lane.b32.xlu0 %v1133_v16, %s1215_s7  ;;  %v954_v16 = vmul.f32 -1.442695, %v168_v12 }
 0xd65   :  { %v540_v17 = vpop.permute.xlu0 %539 }
 0xd66   :  { %v542_v18 = vmul.f32 %v1131_v7, %v540_v17 }
 0xd68   :  { %v543_v19 = vpack.c.bf16 %v542_v18, %v542_v18 }
 0xd6a   :  { %545 = vrot.lane.b32.xlu1 %v543_v19, %s1220_s2 }
 0xddc   :  { %v546_v20 = vpop.permute.xlu1 %545 }
 0xddd   :  { %1037 = vmatmul.mubr.msk.bf16.vlgmr.msra.gmra.mrb[16].mxu1 %vm186_vm2, %v546_v20 }
 0xdde   :  { %1049 = vmatpush3.bf16.msra.mxu1 %v1279_v3  ;;  %1052 = vmatprep.mubr.msk.bf16.mxu1 %vm1219_vm0, %v1217_v0 }
 0xddf   :  { %1050 = vmatprep.subr.bf16.mxu1 %v1217_v0 }
 0xde2   :  { %1051 = vmatpush3.bf16.msra.mxu1 %v1289_v6 }
 0xde3   :  { %1064 = vmatprep.subr.bf16.mxu1 %v1217_v0 }
 0xeb0   :  { %v584_v22 = vpop.f32.mrb[16].mxu1 }
 0xeb1   :  { %v590_v23 = vadd.f32 %v584_v22, %v158_v21  ;;  %v1038_v24 = vpop.f32.mrb[17].mxu1 }
 0xeb2   :  { %v587_v25 = vpop.f32.mrb[18].mxu1 }
 0xeb3   :  { %1134 = vtanh.f32 %v590_v23  ;;  %v1039_v26 = vpop.f32.mrb[19].mxu1  ;;  %v949_v3 = vmul.f32 -1.442695, %v590_v23  ;;  %v1090_v23 = vld [vmem:[%s1463_s4 + $0x10] sm:$0xff]  }
 0xeb5   :  { %1136 = vpow2.f32 %v949_v3  ;;  %v1091_v3 = vld [vmem:[%s1463_s4 + $0x18] sm:$0xff]  }
 0xebd   :  { %v1135_v27 = vpop.eup %1134 }
 0xebe   :  { %600 = vrot.lane.b32.xlu0 %v1135_v27, %s1215_s7 }
 0xebf   :  { %v1137_v28 = vpop.eup %1136 }
 0xec0   :  { %v594_v29 = vadd.f32 1.0, %v1137_v28  ;;  %v1092_v28 = vld [vmem:[%s1463_s4] sm:$0xff]  }
 0xec2   :  { %1138 = vrcp.f32 %v594_v29  ;;  %v1093_v29 = vld [vmem:[%s1463_s4 + $0x8] sm:$0xff]  }
 0xecc   :  { %v1139_v30 = vpop.eup %1138 }
 0xecd   :  { %v598_v32 = vmul.f32 %v1139_v30, %v536_v15 }
 0xf30   :  { %v601_v6 = vpop.permute.xlu0 %600 }
 0xf31   :  { %v603_v31 = vmul.f32 %v1139_v30, %v601_v6 }
 0xf33   :  { %605 = vrot.lane.b32.xlu1 %v603_v31, %s1220_s2 }
 0xfa5   :  { %v606_v33 = vpop.permute.xlu1 %605 }
 0xfa6   :  { %v608_v34 = vadd.f32 %v606_v33, %v598_v32 }
 0xfa8   :  { %1140 = vtanh.f32 %v608_v34 }
 0xfb2   :  { %v1141_v35 = vpop.eup %1140 }
 0xfb3   :  { %611 = vrot.lane.b32.xlu0 %v1141_v35, %s1215_s7 }
0x1025   :  { %v612_v36 = vpop.permute.xlu0 %611 }
0x1026   :  { %v614_v37 = vmul.f32 %v1139_v30, %v612_v36 }
0x1028   :  { %v615_v38 = vpack.c.bf16 %v614_v37, %v614_v37 }
0x102a   :  { %617 = vrot.lane.b32.xlu1 %v615_v38, %s1220_s2 }
0x109c   :  { %v618_v39 = vpop.permute.xlu1 %617 }
0x109d   :  { %1045 = vmatmul.mubr.msk.bf16.vlgmr.msra.gmra.mrb[20].mxu0 %vm186_vm2, %v618_v39 }
0x109e   :  { %1060 = vmatprep.mubr.msk.bf16.mxu0 %vm1219_vm0, %v1217_v0  ;;  %1057 = vmatpush3.bf16.msra.mxu0 %v1090_v23 }
0x109f   :  { %1058 = vmatprep.subr.bf16.mxu0 %v1217_v0 }
0x10a2   :  { %1059 = vmatpush3.bf16.msra.mxu0 %v1091_v3 }
0x1170   :  { %v656_v41 = vpop.f32.mrb[20].mxu0 }
0x1171   :  { %v662_v42 = vadd.f32 %v656_v41, %v163_v40  ;;  %v1046_v43 = vpop.f32.mrb[21].mxu0 }
0x1172   :  { %v659_v44 = vpop.f32.mrb[22].mxu0 }
0x1173   :  { %1142 = vtanh.f32 %v662_v42  ;;  %v1047_v45 = vpop.f32.mrb[23].mxu0  ;;  %v951_v47 = vmul.f32 -1.442695, %v662_v42  ;;  %v961_v42 = vld [vmem:[%s1464_s5] ss:$0 sm:$0xff] }
0x1175   :  { %1144 = vpow2.f32 %v951_v47 }
0x117d   :  { %v1143_v46 = vpop.eup %1142 }
0x117e   :  { %672 = vrot.lane.b32.xlu0 %v1143_v46, %s1215_s7 }
0x117f   :  { %v1145_v48 = vpop.eup %1144 }
0x1180   :  { %v666_v49 = vadd.f32 1.0, %v1145_v48 }
0x1182   :  { %1146 = vrcp.f32 %v666_v49 }
0x118c   :  { %v1147_v50 = vpop.eup %1146 }
0x118d   :  { %v670_v52 = vmul.f32 %v1147_v50, %v608_v34 }
0x11f0   :  { %v673_v1 = vpop.permute.xlu0 %672 }
0x11f1   :  { %v675_v51 = vmul.f32 %v1147_v50, %v673_v1 }
0x11f3   :  { %677 = vrot.lane.b32.xlu1 %v675_v51, %s1220_s2 }
0x1265   :  { %v678_v53 = vpop.permute.xlu1 %677 }
0x1266   :  { %v680_v56 = vadd.f32 %v678_v53, %v670_v52 }
0x1268   :  { %1148 = vtanh.f32 %v680_v56 }
0x1272   :  { %v1149_v57 = vpop.eup %1148 }
0x1273   :  { %683 = vrot.lane.b32.xlu0 %v1149_v57, %s1215_s7 }
0x12e5   :  { %v684_v58 = vpop.permute.xlu0 %683 }
0x12e6   :  { %v686_v59 = vmul.f32 %v1147_v50, %v684_v58 }
0x12e8   :  { %v687_v60 = vpack.c.bf16 %v686_v59, %v686_v59 }
0x12ea   :  { %689 = vrot.lane.b32.xlu1 %v687_v60, %s1220_s2 }
0x135c   :  { %v690_v61 = vpop.permute.xlu1 %689 }
0x135d   :  { %1053 = vmatmul.mubr.msk.bf16.vlgmr.msra.gmra.mrb[20].mxu1 %vm186_vm2, %v690_v61 }
0x135e   :  { %1068 = vmatprep.mubr.msk.bf16.mxu1 %vm1219_vm0, %v1217_v0  ;;  %1065 = vmatpush3.bf16.msra.mxu1 %v1092_v28 }
0x135f   :  { %1066 = vmatprep.subr.bf16.mxu1 %v1217_v0 }
0x1362   :  { %1067 = vmatpush3.bf16.msra.mxu1 %v1093_v29 }
0x1430   :  { %v728_v4 = vpop.f32.mrb[20].mxu1 }
0x1431   :  { %v734_v5 = vadd.f32 %v728_v4, %v166_v63  ;;  %v1054_v7 = vpop.f32.mrb[21].mxu1 }
0x1432   :  { %v731_v9 = vpop.f32.mrb[22].mxu1 }
0x1433   :  { %1150 = vtanh.f32 %v734_v5  ;;  %v1055_v13 = vpop.f32.mrb[23].mxu1  ;;  %v953_v8 = vmul.f32 -1.442695, %v734_v5 }
0x1434   :  { %1152 = vtanh.f32 %v168_v12 }
0x1435   :  { %1154 = vpow2.f32 %v953_v8 }
0x1436   :  { %1156 = vpow2.f32 %v954_v16 }
0x143d   :  { %v1151_v14 = vpop.eup %1150 }
0x143e   :  { %744 = vrot.lane.b32.xlu0 %v1151_v14, %s1215_s7  ;;  %v1153_v15 = vpop.eup %1152 }
0x143f   :  { %v1155_v10 = vpop.eup %1154 }
0x1440   :  { %v738_v11 = vadd.f32 1.0, %v1155_v10  ;;  %v1157_v54 = vpop.eup %1156 }
0x1441   :  { %v762_v17 = vadd.f32 1.0, %v1157_v54 }
0x1442   :  { %767 = vrot.lane.b32.xlu0 %v1153_v15, %s1215_s7  ;;  %1158 = vrcp.f32 %v738_v11 }
0x1443   :  { %1160 = vrcp.f32 %v762_v17 }
0x144c   :  { %v1159_v55 = vpop.eup %1158 }
0x144d   :  { %v1161_v20 = vpop.eup %1160  ;;  %v742_v25 = vmul.f32 %v1159_v55, %v680_v56 }
0x14b0   :  { %v745_v18 = vpop.permute.xlu0 %744 }
0x14b1   :  { %v747_v19 = vmul.f32 %v1159_v55, %v745_v18 }
0x14b3   :  { %749 = vrot.lane.b32.xlu1 %v747_v19, %s1220_s2 }
0x14b4   :  { %v768_v21 = vpop.permute.xlu0 %767 }
0x14b5   :  { %v770_v22 = vmul.f32 %v1161_v20, %v768_v21 }
0x14b7   :  { %1162 = vtanh.f32 %v770_v22 }
0x14c1   :  { %v1163_v24 = vpop.eup %1162 }
0x14c2   :  { %773 = vrot.lane.b32.xlu0 %v1163_v24, %s1221_s24 }
0x1525   :  { %v750_v26 = vpop.permute.xlu1 %749 }
0x1526   :  { %v752_v27 = vadd.f32 %v750_v26, %v742_v25 }
0x1528   :  { %1164 = vtanh.f32 %v752_v27 }
0x1532   :  { %v1165_v30 = vpop.eup %1164 }
0x1533   :  { %755 = vrot.lane.b32.xlu1 %v1165_v30, %s1215_s7 }
0x1534   :  { %v774_v6 = vpop.permute.xlu0 %773 }
0x1535   :  { %v776_v31 = vmul.f32 %v1161_v20, %v774_v6 }
0x1537   :  { %v786_v32 = vpack.c.bf16 %v776_v31, %v776_v31 }
0x1539   :  { %788 = vrot.lane.b32.xlu1 %v786_v32, %s1220_s2 }
0x15a5   :  { %v756_v33 = vpop.permute.xlu1 %755 }
0x15a6   :  { %v758_v34 = vmul.f32 %v1159_v55, %v756_v33 }
0x15a8   :  { %v785_v35 = vpack.c.bf16 %v758_v34, %v758_v34 }
0x15aa   :  { %846 = vrot.lane.b32.xlu0 %v785_v35, %s1220_s2 }
0x15ab   :  { %v789_v36 = vpop.permute.xlu1 %788 }
0x15ac   :  { %1061 = vmatmul.mubr.msk.bf16.vlgmr.msra.gmra.mrb[24].mxu0 %vm186_vm2, %v789_v36 }
0x161c   :  { %v847_v37 = vpop.permute.xlu0 %846 }
0x161d   :  { %1069 = vmatmul.mubr.msk.bf16.vlgmr.msra.gmra.mrb[24].mxu1 %vm186_vm2, %v847_v37 }
0x167f   :  { %v839_v0 = vpop.f32.mrb[24].mxu0 }
0x1680   :  { %v1062_v38 = vpop.f32.mrb[25].mxu0 }
0x1681   :  { %v842_v39 = vpop.f32.mrb[26].mxu0 }
0x1682   :  { %v1063_v40 = vpop.f32.mrb[27].mxu0 }
0x16f0   :  { %v897_v41 = vpop.f32.mrb[24].mxu1 }
0x16f1   :  { %v898_v43 = vadd.f32 %v897_v41, %v839_v0  ;;  %v1070_v44 = vpop.f32.mrb[25].mxu1 }
0x16f2   :  { %v900_v45 = vpop.f32.mrb[26].mxu1 }
0x16f3   :  { %v910_v46 = vadd.f32 %v961_v42, %v898_v43  ;;  %v1071_v47 = vpop.f32.mrb[27].mxu1 }
0x16f5   :  { %911 = vst [vmem:[#allocation5] sm:$0xff] %v910_v46 }
0x16f6   :  { %1199 = shalt.err (!%p1196_p12)
}
0x16f7   :  { %s1200_s5 = scalar_lea.hbm %s1465_s6, 128 }
0x16f8   :  { %p1201_p13 = scmp.ne.s32.totalorder %s1465_s6, %s1200_s5  ;;  %p1204_p0 = scmp.lt.u32.totalorder %s1200_s5, %s1465_s6 }
0x16fa   :  { %p1206_p1 = pnand %p1204_p0, %p1201_p13 }
0x16fc   :  { %1209 = shalt.err (!%p1206_p1)
}
0x16fd   :  { %921 = dma.vmem_to_hbm [thread:$0]  %s919_s9, 128, %s1465_s6, [#allocation4]  }
0x16fe   :  { %1212 = dma.done.wait [#allocation4], 128  }
0x16ff   :  { %1213 = vsyncadd [#allocation4], 4294967168 }
0x1700   :  { %925 = vsyncpa [#allocation3], 1 }
0x1701   :  { %926 = vsyncpa [#allocation4], 1 }

</bundles_post_ra>
